<compile_context>
chip_gen: v6e
topology: v6e:2x2x1
jax: 0.10.0
libtpu: 0.0.40
codegen_flags: <defaults>
</compile_context>

<pallas_src>
import functools

import numpy as np

import jax
import jax.numpy as jnp
from jax import lax
from jax.experimental import pallas as pl
from jax.experimental.pallas import tpu as pltpu


def _masked_conv_kernel(x_ref, w_ref, b_ref, o_ref, *, taps, wp, n_rows, dil):
    """x_ref: (1, Cin, Hp*Wp) flat zero-padded image of one sample.
    w_ref: (n_taps, Cout, Cin) mask-folded per-tap weights.
    b_ref: (Cout, 1).   o_ref: (1, Cout, n_rows*Wp)."""
    span = n_rows * wp
    acc = None
    for t, (ky, kx) in enumerate(taps):
        # Output pixel (r, c) needs x_pad[r + ky*d, c + kx*d]; on the flat
        # row-major padded image that is ONE contiguous shifted window, so a
        # single static slice feeds a single MXU matmul per tap.
        start = ky * dil * wp + kx * dil                    # static offset
        slab = x_ref[0, :, start:start + span]              # (Cin, span)
        part = jnp.dot(w_ref[t], slab,
                       preferred_element_type=jnp.float32)  # (Cout, span)
        acc = part if acc is None else acc + part
    acc = acc + b_ref[...]                                  # (Cout,1) bcast
    o_ref[0] = acc.astype(o_ref.dtype)                      # lane-dense store


def _padded_vmem_bytes(shape, itemsize):
    """Rough VMEM footprint of one buffer after (8,128) tile padding."""
    s = list(shape)
    s[-1] = -(-s[-1] // 128) * 128
    if len(s) >= 2:
        s[-2] = -(-s[-2] // 8) * 8
    n = 1
    for v in s:
        n *= v
    return n * itemsize


def masked_dilated_conv3x3(x_nchw, w_oihw, mask, bias, dilated_value=1):
    """NCHW in / NCHW out, matching the PyTorch E2 module's forward."""
    N, Cin, H, W = x_nchw.shape
    Cout = w_oihw.shape[0]
    d = int(dilated_value)

    # Fold the (static) mask once; keep only the taps it leaves alive.
    mask = np.asarray(mask, dtype=np.float32)
    taps = tuple((ky, kx) for ky in range(3) for kx in range(3)
                 if float(mask[ky, kx]) != 0.0)
    if not taps:  # fully-masked conv degenerates to a bias broadcast
        return jnp.broadcast_to(bias.reshape(1, Cout, 1, 1),
                                (N, Cout, H, W)).astype(x_nchw.dtype)
    w_taps = jnp.stack([w_oihw[:, :, ky, kx] * float(mask[ky, kx])
                        for ky, kx in taps], axis=0)         # (n_taps,Cout,Cin)
    b2 = bias.reshape(Cout, 1)

    # Zero-pad (padding = dilation) plus ONE extra bottom row so the furthest
    # shifted flat window (tap ky=kx=2) stays inside the staged block.
    x_pad = jnp.pad(x_nchw, ((0, 0), (0, 0), (d, d + 1), (d, d)))
    Hp, Wp = H + 2 * d + 1, W + 2 * d
    x_flat = x_pad.reshape(N, Cin, Hp * Wp)   # row-major -> free bitcast

    kernel = functools.partial(_masked_conv_kernel, taps=taps, wp=Wp,
                               n_rows=H, dil=d)

    itemsize = jnp.dtype(x_nchw.dtype).itemsize
    vmem_need = (2 * (_padded_vmem_bytes((Cin, Hp * Wp), itemsize)
                      + _padded_vmem_bytes((Cout, H * Wp), itemsize))
                 + _padded_vmem_bytes((len(taps), Cout, Cin), 4)
                 + _padded_vmem_bytes((Cout, 1), 4) + (1 << 20))
    cost = pl.CostEstimate(
        flops=2 * N * Cout * Cin * len(taps) * H * Wp,
        transcendentals=0,
        bytes_accessed=(x_flat.size + w_taps.size + b2.size
                        + N * Cout * H * Wp) * itemsize)

    out_flat = pl.pallas_call(
        kernel,
        out_shape=jax.ShapeDtypeStruct((N, Cout, H * Wp), x_nchw.dtype),
        grid=(N,),
        in_specs=[
            # whole flat padded image of sample n (halo rows included)
            pl.BlockSpec((1, Cin, Hp * Wp), lambda n: (n, 0, 0)),
            pl.BlockSpec((len(taps), Cout, Cin), lambda n: (0, 0, 0)),
            pl.BlockSpec((Cout, 1), lambda n: (0, 0)),
        ],
        out_specs=pl.BlockSpec((1, Cout, H * Wp), lambda n: (n, 0, 0)),
        compiler_params=pltpu.CompilerParams(
            dimension_semantics=("parallel",),
            vmem_limit_bytes=max(vmem_need, 32 * 1024 * 1024)),
        cost_estimate=cost,
    )(x_flat, w_taps, b2)

    # Drop the Wp-W junk columns produced by the flat-window trick; the
    # reshape back toward NCHW is layout-only, the slice is a tiny XLA copy.
    return out_flat.reshape(N, Cout, H, Wp)[:, :, :, :W]


if __name__ == "__main__":
    in_ch, out_ch = 4, 8
    N, H, W = 2, 16, 16

    key = jax.random.PRNGKey(0)
    kx_, kw_, kb_ = jax.random.split(key, 3)

    x = jax.random.normal(kx_, (N, in_ch, H, W), dtype=jnp.float32)
    # Deterministic "synthetic checkpoint": PyTorch-shaped (OIHW) weight + bias.
    w = jax.random.normal(kw_, (out_ch, in_ch, 3, 3), dtype=jnp.float32) * 0.1
    b = jax.random.normal(kb_, (out_ch,), dtype=jnp.float32) * 0.1
    # E2's mask from the PyTorch module.
    mask = np.array([[1.0, 1.0, 1.0],
                     [0.0, 1.0, 1.0],
                     [0.0, 0.0, 1.0]], dtype=np.float32)

    ok = True
    for d in (1, 2):   # exercise both padding/dilation configurations of E2
        out = jax.block_until_ready(
            masked_dilated_conv3x3(x, w, mask, b, dilated_value=d))

        # Plain-JAX reference (f32, HIGHEST precision).
        wm = w * jnp.asarray(mask)[None, None, :, :]
        ref = lax.conv_general_dilated(
            x, wm, window_strides=(1, 1),
            padding=((d, d), (d, d)), rhs_dilation=(d, d),
            dimension_numbers=("NCHW", "OIHW", "NCHW"),
            precision=lax.Precision.HIGHEST,
        ) + b[None, :, None, None]

        ok = ok and (out.shape == (N, out_ch, H, W))
        # Tolerance covers MXU multi-pass f32 matmul vs XLA HIGHEST reference.
        ok = ok and bool(jnp.allclose(out, ref, atol=2e-3, rtol=2e-3))

    assert ok
    print("KERNEL_OK")
</pallas_src>

<mosaic_0001>
module attributes {stable_mosaic.version = 11 : i64} {
  func.func @_masked_conv_kernel(%arg0: i32, %arg1: memref<1x4x342xf32, #tpu.memory_space<vmem>>, %arg2: memref<6x8x4xf32, #tpu.memory_space<vmem>>, %arg3: memref<8x1xf32, #tpu.memory_space<vmem>>, %arg4: memref<1x8x288xf32, #tpu.memory_space<vmem>>) attributes {dimension_semantics = [#tpu.dimension_semantics<parallel>], iteration_bounds = array<i64: 2>, scalar_prefetch = 0 : i64, scratch_operands = 0 : i64, tpu.core_type = #tpu.core_type<tc>, window_params = [{transform_indices = @transform_0, window_bounds = array<i64: 1, 4, 342>}, {pipeline_mode = #tpu.pipeline_mode<synchronous>, transform_indices = @transform_1, window_bounds = array<i64: 6, 8, 4>}, {pipeline_mode = #tpu.pipeline_mode<synchronous>, transform_indices = @transform_2, window_bounds = array<i64: 8, 1>}, {transform_indices = @transform_3, window_bounds = array<i64: 1, 8, 288>}]} {
    %c0 = arith.constant 0 : index
    %c0_0 = arith.constant 0 : index
    %c0_1 = arith.constant 0 : index
    %0 = vector.load %arg1[%c0, %c0_0, %c0_1] : memref<1x4x342xf32, #tpu.memory_space<vmem>>, vector<1x4x288xf32>
    %1 = vector.shape_cast %0 : vector<1x4x288xf32> to vector<4x288xf32>
    %c0_2 = arith.constant 0 : index
    %c0_3 = arith.constant 0 : index
    %c0_4 = arith.constant 0 : index
    %2 = vector.load %arg2[%c0_2, %c0_3, %c0_4] : memref<6x8x4xf32, #tpu.memory_space<vmem>>, vector<1x8x4xf32>
    %3 = vector.shape_cast %2 : vector<1x8x4xf32> to vector<8x4xf32>
    %cst = arith.constant dense<0.000000e+00> : vector<8x288xf32>
    %4 = tpu.matmul %3, %1, %cst {dimension_numbers = #tpu.dot_dimension_numbers<[1], [0], [0], [1], [0, 0, 1, 1], [], []>} : vector<8x4xf32>, vector<4x288xf32>, vector<8x288xf32> -> vector<8x288xf32>
    %c0_5 = arith.constant 0 : index
    %c0_6 = arith.constant 0 : index
    %c1 = arith.constant 1 : index
    %5 = vector.load %arg1[%c0_5, %c0_6, %c1] : memref<1x4x342xf32, #tpu.memory_space<vmem>>, vector<1x4x288xf32>
    %6 = vector.shape_cast %5 : vector<1x4x288xf32> to vector<4x288xf32>
    %c1_7 = arith.constant 1 : index
    %c0_8 = arith.constant 0 : index
    %c0_9 = arith.constant 0 : index
    %7 = vector.load %arg2[%c1_7, %c0_8, %c0_9] : memref<6x8x4xf32, #tpu.memory_space<vmem>>, vector<1x8x4xf32>
    %8 = vector.shape_cast %7 : vector<1x8x4xf32> to vector<8x4xf32>
    %cst_10 = arith.constant dense<0.000000e+00> : vector<8x288xf32>
    %9 = tpu.matmul %8, %6, %cst_10 {dimension_numbers = #tpu.dot_dimension_numbers<[1], [0], [0], [1], [0, 0, 1, 1], [], []>} : vector<8x4xf32>, vector<4x288xf32>, vector<8x288xf32> -> vector<8x288xf32>
    %10 = arith.addf %4, %9 : vector<8x288xf32>
    %c0_11 = arith.constant 0 : index
    %c0_12 = arith.constant 0 : index
    %c2 = arith.constant 2 : index
    %11 = vector.load %arg1[%c0_11, %c0_12, %c2] : memref<1x4x342xf32, #tpu.memory_space<vmem>>, vector<1x4x288xf32>
    %12 = vector.shape_cast %11 : vector<1x4x288xf32> to vector<4x288xf32>
    %c2_13 = arith.constant 2 : index
    %c0_14 = arith.constant 0 : index
    %c0_15 = arith.constant 0 : index
    %13 = vector.load %arg2[%c2_13, %c0_14, %c0_15] : memref<6x8x4xf32, #tpu.memory_space<vmem>>, vector<1x8x4xf32>
    %14 = vector.shape_cast %13 : vector<1x8x4xf32> to vector<8x4xf32>
    %cst_16 = arith.constant dense<0.000000e+00> : vector<8x288xf32>
    %15 = tpu.matmul %14, %12, %cst_16 {dimension_numbers = #tpu.dot_dimension_numbers<[1], [0], [0], [1], [0, 0, 1, 1], [], []>} : vector<8x4xf32>, vector<4x288xf32>, vector<8x288xf32> -> vector<8x288xf32>
    %16 = arith.addf %10, %15 : vector<8x288xf32>
    %c0_17 = arith.constant 0 : index
    %c0_18 = arith.constant 0 : index
    %c19 = arith.constant 19 : index
    %17 = vector.load %arg1[%c0_17, %c0_18, %c19] : memref<1x4x342xf32, #tpu.memory_space<vmem>>, vector<1x4x288xf32>
    %18 = vector.shape_cast %17 : vector<1x4x288xf32> to vector<4x288xf32>
    %c3 = arith.constant 3 : index
    %c0_19 = arith.constant 0 : index
    %c0_20 = arith.constant 0 : index
    %19 = vector.load %arg2[%c3, %c0_19, %c0_20] : memref<6x8x4xf32, #tpu.memory_space<vmem>>, vector<1x8x4xf32>
    %20 = vector.shape_cast %19 : vector<1x8x4xf32> to vector<8x4xf32>
    %cst_21 = arith.constant dense<0.000000e+00> : vector<8x288xf32>
    %21 = tpu.matmul %20, %18, %cst_21 {dimension_numbers = #tpu.dot_dimension_numbers<[1], [0], [0], [1], [0, 0, 1, 1], [], []>} : vector<8x4xf32>, vector<4x288xf32>, vector<8x288xf32> -> vector<8x288xf32>
    %22 = arith.addf %16, %21 : vector<8x288xf32>
    %c0_22 = arith.constant 0 : index
    %c0_23 = arith.constant 0 : index
    %c20 = arith.constant 20 : index
    %23 = vector.load %arg1[%c0_22, %c0_23, %c20] : memref<1x4x342xf32, #tpu.memory_space<vmem>>, vector<1x4x288xf32>
    %24 = vector.shape_cast %23 : vector<1x4x288xf32> to vector<4x288xf32>
    %c4 = arith.constant 4 : index
    %c0_24 = arith.constant 0 : index
    %c0_25 = arith.constant 0 : index
    %25 = vector.load %arg2[%c4, %c0_24, %c0_25] : memref<6x8x4xf32, #tpu.memory_space<vmem>>, vector<1x8x4xf32>
    %26 = vector.shape_cast %25 : vector<1x8x4xf32> to vector<8x4xf32>
    %cst_26 = arith.constant dense<0.000000e+00> : vector<8x288xf32>
    %27 = tpu.matmul %26, %24, %cst_26 {dimension_numbers = #tpu.dot_dimension_numbers<[1], [0], [0], [1], [0, 0, 1, 1], [], []>} : vector<8x4xf32>, vector<4x288xf32>, vector<8x288xf32> -> vector<8x288xf32>
    %28 = arith.addf %22, %27 : vector<8x288xf32>
    %c0_27 = arith.constant 0 : index
    %c0_28 = arith.constant 0 : index
    %c38 = arith.constant 38 : index
    %29 = vector.load %arg1[%c0_27, %c0_28, %c38] : memref<1x4x342xf32, #tpu.memory_space<vmem>>, vector<1x4x288xf32>
    %30 = vector.shape_cast %29 : vector<1x4x288xf32> to vector<4x288xf32>
    %c5 = arith.constant 5 : index
    %c0_29 = arith.constant 0 : index
    %c0_30 = arith.constant 0 : index
    %31 = vector.load %arg2[%c5, %c0_29, %c0_30] : memref<6x8x4xf32, #tpu.memory_space<vmem>>, vector<1x8x4xf32>
    %32 = vector.shape_cast %31 : vector<1x8x4xf32> to vector<8x4xf32>
    %cst_31 = arith.constant dense<0.000000e+00> : vector<8x288xf32>
    %33 = tpu.matmul %32, %30, %cst_31 {dimension_numbers = #tpu.dot_dimension_numbers<[1], [0], [0], [1], [0, 0, 1, 1], [], []>} : vector<8x4xf32>, vector<4x288xf32>, vector<8x288xf32> -> vector<8x288xf32>
    %34 = arith.addf %28, %33 : vector<8x288xf32>
    %c0_32 = arith.constant 0 : index
    %c0_33 = arith.constant 0 : index
    %35 = vector.load %arg3[%c0_32, %c0_33] : memref<8x1xf32, #tpu.memory_space<vmem>>, vector<8x1xf32>
    %36 = vector.broadcast %35 : vector<8x1xf32> to vector<8x288xf32>
    %37 = arith.addf %34, %36 : vector<8x288xf32>
    %c0_34 = arith.constant 0 : index
    %c0_35 = arith.constant 0 : index
    %c0_36 = arith.constant 0 : index
    %38 = vector.load %arg4[%c0_34, %c0_35, %c0_36] : memref<1x8x288xf32, #tpu.memory_space<vmem>>, vector<1x8x288xf32>
    %39 = vector.shape_cast %38 : vector<1x8x288xf32> to vector<8x288xf32>
    %40 = vector.shape_cast %37 : vector<8x288xf32> to vector<1x8x288xf32>
    tpu.vector_store %arg4[%c0_34, %c0_35, %c0_36], %40 {strides = array<i32>} : memref<1x8x288xf32, #tpu.memory_space<vmem>>, vector<1x8x288xf32>,
    return
  }
  func.func @transform_0(%arg0: i32) -> (i32, i32, i32) {
    %c0_i32 = arith.constant 0 : i32
    %c0_i32_0 = arith.constant 0 : i32
    %c0_i32_1 = arith.constant 0 : i32
    return %arg0, %c0_i32, %c0_i32_0 : i32, i32, i32
  }
  func.func @transform_1(%arg0: i32) -> (i32, i32, i32) {
    %c0_i32 = arith.constant 0 : i32
    %c0_i32_0 = arith.constant 0 : i32
    %c0_i32_1 = arith.constant 0 : i32
    %c0_i32_2 = arith.constant 0 : i32
    return %c0_i32, %c0_i32_0, %c0_i32_1 : i32, i32, i32
  }
  func.func @transform_2(%arg0: i32) -> (i32, i32) {
    %c0_i32 = arith.constant 0 : i32
    %c0_i32_0 = arith.constant 0 : i32
    %c0_i32_1 = arith.constant 0 : i32
    return %c0_i32, %c0_i32_0 : i32, i32
  }
  func.func @transform_3(%arg0: i32) -> (i32, i32, i32) {
    %c0_i32 = arith.constant 0 : i32
    %c0_i32_0 = arith.constant 0 : i32
    %c0_i32_1 = arith.constant 0 : i32
    return %arg0, %c0_i32, %c0_i32_0 : i32, i32, i32
  }
}

</mosaic_0001>

<bundles_post_ra>
// kernel: tpu_custom_call.1
= control target key start
LH: loop header
LB: loop body
LE: loop exit
PB: predicated region body
PF: predicated region fallthrough
CT: control target
= control target key end

     0   :  { %8 = vsyncpa [#allocation3], 0  ;;  %s1650_s0 = inlined_call_operand.vmem [shape: f32[2,4,342], index: 0, kind: input, shape index: {}]   ;;  %s1651_s1 = inlined_call_operand.vmem [shape: f32[6,8,4], index: 1, kind: input, shape index: {}]   ;;  %s1652_s2 = inlined_call_operand.vmem [shape: f32[8,1], index: 2, kind: input, shape index: {}]   ;;  %s1653_s3 = inlined_call_operand.hbm [shape: f32[2,8,288], index: 3, kind: output, shape index: {}]  }
   0x1   :  { %10 = vsyncpa [#allocation3 + $0x1], 0  ;;  %s1480_s12 = smov 0   ;;  %s1482_s13 = smov 0  }
   0x2   :  { %s1484_s14 = smov 0   ;;  %s1486_s15 = smov 0  }
   0x3 LB: > { %s1501_s16 = sadd.s32 4294967295, %s1449_s15   ;;  %s1251_s17 = sadd.s32 4294967294, %s1449_s15   ;;  %s1449_s15 = sphi %s1486_s15, %s1659_s15   ;;  %s1445_s14 = sphi %s1484_s14, %s1658_s14   ;;  %s1441_s13 = sphi %s1482_s13, %s1657_s13   ;;  %s1437_s12 = sphi %s1480_s12, %s1656_s12  }
   0x4   : > { %s1505_s18 = sadd.s32 1, %s1449_s15   ;;  %s91_s19 = sadd.s32 1, %s1445_s14 }
   0x5   : > { %s88_s20 = ssub.s32 %s1449_s15, %s1505_s18  ;;  %p101_p0 = scmp.ne.s32.totalorder %s1445_s14, %s1441_s13 }
   0x6   : > { %p89_p1 = scmp.eq.s32.totalorder %s88_s20, 0  ;;  %p102_p2 = scmp.eq.s32.totalorder %s1501_s16, 1 }
   0x7   : > { %p107_p3 = scmp.ne.s32.totalorder %s1441_s13, %s1437_s12  ;;  %p108_p4 = scmp.eq.s32.totalorder %s1251_s17, 1 }
   0x8   : > { %s1516_s21 = scalar_select %p89_p1, %s1445_s14, %s91_s19  }
   0x9   : > { %p1518_p5 = por %p102_p2, %p101_p0  ;;  %p1522_p6 = por %p108_p4, %p107_p3 }
   0xa   : > { %p1254_p7 = scmp.ge.s32.totalorder %s1449_s15, 1  ;;  %p140_p8 = scmp.lt.s32.totalorder %s1449_s15, 3 }
   0xc   : > { %p141_p9 = pnand %p1254_p7, %p140_p8 }
   0xd   : > { %p164_p10 = scmp.lt.s32.totalorder (!%p141_p9), %s1501_s16, 1  ;;  %s1453_s29 = smov (!%p141_p9), 127  }
   0xe   : > { %144 = sbr.rel (%p141_p9) target bundleno = 382 (0x17e), region = 32  ;;  %s1454_s30 = smov (!%p141_p9), 126  }
   0xf   : > { %s1455_s4 = smov (!%p141_p9), 109   ;;  %s1456_s5 = smov (!%p141_p9), 108  }
  0x10   : > { %s1458_s6 = smov (!%p141_p9), 90  }
  0x13   : > { %v1451_v0 = vmov 0.0   ;;  %vm1452_vm0 = vmmov 0   ;;  %s165_s24 = scalar_select %p164_p10, %s1501_s16, 1  ;;  %v1457_v7 = vmov 0   ;;  %v1164_v9 = vld [vmem:[%s1652_s2] sm:$0xff]  ;;  %vm190_vm1 = vcmask 1043456  }
  0x14   : > { %1306 = vmatprep.subr.mxu1 %v1451_v0  ;;  %1308 = vmatprep.mubr.msk.f32.mxu1 %vm1452_vm0, %v1451_v0  ;;  %v1256_v10 = vld [vmem:[%s1651_s1 + $0x8] sm:$0xff]  ;;  %vm186_vm2 = vcmask 31744   ;;  %vm183_vm3 = vcmask 1039360   ;;  %v171_v13 = vld [vmem:[%s1651_s1] sm:$0xff]  ;;  %vm501_vm4 = vcmask 1031168   ;;  %v1267_v20 = vld [vmem:[%s1651_s1 + $0x10] sm:$0xff] }
  0x15   : > { %261 = vmatprep.mubr.f32.mxu0 %v1451_v0  ;;  %s1337_s25 = smul.u32 12, %s165_s24  ;;  %1386 = vset.pattern.permute.xlu1 %v1457_v7  ;;  %vm670_vm5 = vcmask 891904   ;;  %v1273_v25 = vld [vmem:[%s1651_s1 + $0x18] sm:$0xff]  ;;  %vm839_vm6 = vcmask 883712   ;;  %v1279_v30 = vld [vmem:[%s1651_s1 + $0x20] sm:$0xff]  ;;  %vm1008_vm7 = vcmask 736256  }
  0x16   : > { %1387 = vset.pattern.permute.xlu0 %v1457_v7  ;;  %v1285_v35 = vld [vmem:[%s1651_s1 + $0x28] sm:$0xff]  ;;  %vm1175_vm8 = vcmask 261120  }
  0x17   : > { %s168_s28 = scalar_lea.vmem %s1650_s0, %s1337_s25 }
  0x18   : > { %v170_v1 = vld [vmem:[%s168_s28 + $0x8] sm:$0xf]  ;;  %v169_v2 = vld [vmem:[%s168_s28] sm:$0xff] }
  0x19   : > { %181 = vrot.lane.b32.xlu0 %v170_v1, %s1453_s29  ;;  %177 = vrot.lane.b32.xlu1 %v169_v2, %s1453_s29  ;;  %v494_v3 = vcombine.high %v169_v2, %v169_v2  ;;  %v489_v4 = vld [vmem:[%s168_s28 + $0x8] sm:$0xf] }
  0x1a   : > { %v658_v5 = vld [vmem:[%s168_s28 + $0x8] sm:$0xf] }
  0x1b   : > { %v827_v6 = vld [vmem:[%s168_s28 + $0x8] sm:$0xf] }
  0x1c   : > { %v996_v8 = vld [vmem:[%s168_s28 + $0x8] sm:$0xf] }
  0x1d   : > { %495 = vrot.lane.b32.xlu1 %v169_v2, %s1454_s30  ;;  %179 = vrot.lane.b32.xlu0 %v494_v3, %s1453_s29 }
  0x21   : > { %497 = vrot.lane.b32.xlu1 %v494_v3, %s1454_s30  ;;  %499 = vrot.lane.b32.xlu0 %v489_v4, %s1454_s30  ;;  %s161_s30 = sand.u32 1, %s1441_s13  }
  0x22   : > { %s1178_s11 = scalar_lea.sflag [#allocation3], %s161_s30 }
  0x25   : > { %668 = vrot.lane.b32.xlu1 %v658_v5, %s1455_s4  ;;  %666 = vrot.lane.b32.xlu0 %v494_v3, %s1455_s4 }
  0x29   : > { %835 = vrot.lane.b32.xlu1 %v494_v3, %s1456_s5  ;;  %664 = vrot.lane.b32.xlu0 %v169_v2, %s1455_s4  ;;  %s1336_s4 = smul.u32 24, %s161_s30 }
  0x2d   : > { %833 = vrot.lane.b32.xlu1 %v169_v2, %s1456_s5  ;;  %837 = vrot.lane.b32.xlu0 %v827_v6, %s1456_s5  ;;  %s163_s5 = scalar_lea.vmem [#allocation2], %s1336_s4 }
  0x2e   : > { %s1192_s7 = sshll.u32 %s163_s5, 4  ;;  %s1193_s7 = int_to_ptr.vmem [resolvable:$true] %s1192_s7 }
  0x2f   : > { %s1389_s17 = scalar_lea.vmem %s1193_s7, 384 }
  0x30   : > { %p1390_p11 = scmp.ne.s32.totalorder %s1193_s7, %s1389_s17 }
  0x31   : > { %1006 = vrot.lane.b32.xlu1 %v996_v8, %s1458_s6  ;;  %1004 = vrot.lane.b32.xlu0 %v494_v3, %s1458_s6 }
  0x32   : > { %p1391_p12 = pnand %p1390_p11, %p1518_p5 }
  0x34   : > { %p1392_p13 = pneg %p1391_p12 }
  0x35   : > { %1002 = vrot.lane.b32.xlu0 %v169_v2, %s1458_s6  ;;  %1167 = vperm.xlu1 %1386, %v1164_v9   ;;  %s1338_s6 = smul.u32 384, %s1501_s16  ;;  %s1459_s16 = smov [#allocation2]  }
  0x36   : > { %s1393_s19 = sshll.u32 %s1459_s16, 4  ;;  %s1394_s19 = int_to_ptr.vmem [resolvable:$false] %s1393_s19 }
  0x37   : > { %s1190_s10 = scalar_lea.hbm %s1653_s3, %s1338_s6  ;;  %s1395_s20 = scalar_lea.vmem %s1394_s19, 768 }
  0x38   : > { %p1396_p0 = scmp.lt.s32.totalorder %s1193_s7, %s1394_s19  ;;  %p1397_p1 = scmp.lt.s32.totalorder %s1395_s20, %s1389_s17 }
  0x3a   : > { %p1398_p2 = por %p1397_p1, %p1396_p0 }
  0x3c   : > { %p1399_p3 = pnand %p1398_p2, %p1392_p13 }
  0x8b   : > { %v182_v11 = vpop.permute.xlu0 %181  ;;  %v178_v12 = vpop.permute.xlu1 %177 }
  0x8c   : > { %1307 = vmatpush3.msk.msra.mxu1 %vm190_vm1, %v182_v11 }
  0x8d   : > { %1309 = vmatmul.mubr.msk.f32.vlgmr.msra.gmra.mxu1 %vm186_vm2, %v1256_v10  ;;  %1311 = vmatprep.subr.mxu1 %v1451_v0 }
  0x8e   : > { %1312 = vmatpush3.msk.msra.mxu1 %vm190_vm1, %v170_v1  ;;  %1313 = vmatprep.mubr.msk.f32.mxu1 %vm1452_vm0, %v1451_v0 }
  0x8f   : > { %v496_v14 = vpop.permute.xlu1 %495  ;;  %v180_v15 = vpop.permute.xlu0 %179  ;;  %1316 = vmatprep.subr.mxu1 %v1451_v0 }
  0x90   : > { %v185_v16 = vsel %vm183_vm3, %v180_v15, %v182_v11  ;;  %v184_v17 = vsel %vm183_vm3, %v178_v12, %v180_v15 }
  0x91   : > { %1257 = vmatprep.subr.msk.mxu0 %vm190_vm1, %v185_v16  ;;  %1314 = vmatmul.mubr.msk.f32.vlgmr.msra.gmra.mxu1 %vm186_vm2, %v171_v13 }
  0x92   : > { %1258 = vmatpush1.msk.msra.mxu0 %vm190_vm1, %v184_v17  ;;  %1318 = vmatprep.mubr.msk.f32.mxu1 %vm1452_vm0, %v1451_v0 }
  0x93   : > { %v498_v18 = vpop.permute.xlu1 %497  ;;  %1259 = vmatmul.mubr.msk.f32.vlgmr.msra.gmra.mxu0 %vm186_vm2, %v1256_v10  ;;  %1262 = vmatprep.subr.msk.mxu0 %vm190_vm1, %v494_v3  ;;  %v500_v19 = vpop.permute.xlu0 %499 }
  0x94   : > { %v503_v21 = vsel %vm501_vm4, %v498_v18, %v500_v19  ;;  %1263 = vmatpush1.msk.msra.mxu0 %vm190_vm1, %v169_v2  ;;  %1317 = vmatpush3.msk.msra.mxu1 %vm190_vm1, %v500_v19  ;;  %v502_v22 = vsel %vm501_vm4, %v496_v14, %v498_v18 }
  0x95   : > { %1268 = vmatprep.subr.msk.mxu0 %vm190_vm1, %v503_v21  ;;  %411 = vmatprep.mubr.f32.mxu0 %v1451_v0 }
  0x96   : > { %1319 = vmatmul.mubr.msk.f32.vlgmr.msra.gmra.mxu1 %vm186_vm2, %v1267_v20  ;;  %1321 = vmatprep.subr.mxu1 %v1451_v0 }
  0x97   : > { %v669_v23 = vpop.permute.xlu1 %668  ;;  %1264 = vmatmul.mubr.msk.f32.vlgmr.msra.gmra.mxu0 %vm186_vm2, %v171_v13  ;;  %v667_v24 = vpop.permute.xlu0 %666  ;;  %1323 = vmatprep.mubr.msk.f32.mxu1 %vm1452_vm0, %v1451_v0 }
  0x98   : > { %1269 = vmatpush1.msk.msra.mxu0 %vm190_vm1, %v502_v22  ;;  %v672_v26 = vsel %vm670_vm5, %v667_v24, %v669_v23  ;;  %577 = vmatprep.mubr.f32.mxu0 %v1451_v0 }
  0x99   : > { %1274 = vmatprep.subr.msk.mxu0 %vm190_vm1, %v672_v26  ;;  %1322 = vmatpush3.msk.msra.mxu1 %vm190_vm1, %v669_v23 }
  0x9a   : > { %1324 = vmatmul.mubr.msk.f32.vlgmr.msra.gmra.mxu1 %vm186_vm2, %v1273_v25  ;;  %1326 = vmatprep.subr.mxu1 %v1451_v0 }
  0x9b   : > { %v836_v27 = vpop.permute.xlu1 %835  ;;  %1270 = vmatmul.mubr.msk.f32.vlgmr.msra.gmra.mxu0 %vm186_vm2, %v1267_v20  ;;  %v665_v28 = vpop.permute.xlu0 %664  ;;  %1328 = vmatprep.mubr.msk.f32.mxu1 %vm1452_vm0, %v1451_v0 }
  0x9c   : > { %v671_v29 = vsel %vm670_vm5, %v665_v28, %v667_v24  ;;  %746 = vmatprep.mubr.f32.mxu0 %v1451_v0 }
  0x9d   : > { %1275 = vmatpush1.msk.msra.mxu0 %vm190_vm1, %v671_v29 }
  0x9f   : > { %v834_v31 = vpop.permute.xlu1 %833  ;;  %1276 = vmatmul.mubr.msk.f32.vlgmr.msra.gmra.mxu0 %vm186_vm2, %v1273_v25  ;;  %v838_v32 = vpop.permute.xlu0 %837 }
  0xa0   : > { %v840_v33 = vsel %vm839_vm6, %v834_v31, %v836_v27  ;;  %v841_v34 = vsel %vm839_vm6, %v836_v27, %v838_v32  ;;  %1327 = vmatpush3.msk.msra.mxu1 %vm190_vm1, %v838_v32  ;;  %915 = vmatprep.mubr.f32.mxu0 %v1451_v0 }
  0xa1   : > { %1280 = vmatprep.subr.msk.mxu0 %vm190_vm1, %v841_v34  ;;  %1329 = vmatmul.mubr.msk.f32.vlgmr.msra.gmra.mxu1 %vm186_vm2, %v1279_v30 }
  0xa2   : > { %1281 = vmatpush1.msk.msra.mxu0 %vm190_vm1, %v840_v33  ;;  %1331 = vmatprep.subr.mxu1 %v1451_v0 }
  0xa3   : > { %v1007_v36 = vpop.permute.xlu1 %1006  ;;  %1282 = vmatmul.mubr.msk.f32.vlgmr.msra.gmra.mxu0 %vm186_vm2, %v1279_v30  ;;  %v1005_v37 = vpop.permute.xlu0 %1004  ;;  %1333 = vmatprep.mubr.msk.f32.mxu1 %vm1452_vm0, %v1451_v0 }
  0xa4   : > { %v1010_v38 = vsel %vm1008_vm7, %v1005_v37, %v1007_v36  ;;  %1332 = vmatpush3.msk.msra.mxu1 %vm190_vm1, %v1007_v36  ;;  %1084 = vmatprep.mubr.f32.mxu0 %v1451_v0 }
  0xa5   : > { %1286 = vmatprep.subr.msk.mxu0 %vm190_vm1, %v1010_v38  ;;  %1334 = vmatmul.mubr.msk.f32.vlgmr.msra.gmra.mxu1 %vm186_vm2, %v1285_v35 }
  0xa7   : > { %v1003_v39 = vpop.permute.xlu0 %1002 }
  0xa8   : > { %v1009_v40 = vsel %vm1008_vm7, %v1003_v39, %v1005_v37 }
  0xa9   : > { %1287 = vmatpush1.msk.msra.mxu0 %vm190_vm1, %v1009_v40 }
  0xaa   : > { %1288 = vmatmul.mubr.msk.f32.vlgmr.msra.gmra.mxu0 %vm186_vm2, %v1285_v35 }
  0xb0   : > { %v1168_v4 = vpop.permute.xlu1 %1167 }
 0x14d   : > { %v334_v41 = vpop.f32.mrf.mxu1 }
 0x14f   : > { %v1310_v42 = vpop.f32.mrf.mxu1 }
 0x151   : > { %v484_v43 = vpop.f32.mrf.mxu1 }
 0x152   : > { %v485_v51 = vadd.f32 %v484_v43, %v334_v41 }
 0x153   : > { %v263_v44 = vpop.f32.mrf.mxu0  ;;  %v1315_v45 = vpop.f32.mrf.mxu1 }
 0x155   : > { %v265_v46 = vpop.f32.mrf.mxu0 }
 0x156   : > { %v650_v47 = vpop.f32.mrf.mxu1 }
 0x157   : > { %v413_v48 = vpop.f32.mrf.mxu0  ;;  %v656_v56 = vadd.f32 %v650_v47, %v485_v51 }
 0x158   : > { %v1320_v49 = vpop.f32.mrf.mxu1  ;;  %v414_v61 = vadd.f32 %v413_v48, %v263_v44 }
 0x159   : > { %v415_v50 = vpop.f32.mrf.mxu0 }
 0x15a   : > { %v819_v52 = vpop.f32.mrf.mxu1  ;;  %v416_v1 = vadd.f32 %v415_v50, %v265_v46 }
 0x15b   : > { %v579_v53 = vpop.f32.mrf.mxu0  ;;  %v825_v60 = vadd.f32 %v819_v52, %v656_v56 }
 0x15c   : > { %v1325_v54 = vpop.f32.mrf.mxu1  ;;  %v654_v2 = vadd.f32 %v579_v53, %v414_v61 }
 0x15d   : > { %v581_v55 = vpop.f32.mrf.mxu0 }
 0x15e   : > { %v655_v6 = vadd.f32 %v581_v55, %v416_v1 }
 0x15f   : > { %v748_v57 = vpop.f32.mrf.mxu0 }
 0x160   : > { %v823_v7 = vadd.f32 %v748_v57, %v654_v2 }
 0x161   : > { %v750_v58 = vpop.f32.mrf.mxu0  ;;  %v988_v59 = vpop.f32.mrf.mxu1 }
 0x162   : > { %v994_v63 = vadd.f32 %v988_v59, %v825_v60  ;;  %v824_v11 = vadd.f32 %v750_v58, %v655_v6 }
 0x163   : > { %v1330_v62 = vpop.f32.mrf.mxu1  ;;  %v917_v0 = vpop.f32.mrf.mxu0 }
 0x164   : > { %v992_v12 = vadd.f32 %v917_v0, %v823_v7 }
 0x165   : > { %v1157_v3 = vpop.f32.mrf.mxu1  ;;  %v919_v9 = vpop.f32.mrf.mxu0 }
 0x166   : > { %v1163_v5 = vadd.f32 %v1157_v3, %v994_v63  ;;  %v993_v14 = vadd.f32 %v919_v9, %v824_v11 }
 0x167   : > { %v1335_v8 = vpop.f32.mrf.mxu1 }
 0x168   : > { %v1172_v10 = vadd.f32 %v1168_v4, %v1163_v5 }
 0x16a   : > { %1176 = vst.msk [vmem:[%s163_s5 + $0x10] sm:$0xff] %vm1175_vm8, %v1172_v10  ;;  %v1086_v13 = vpop.f32.mrf.mxu0 }
 0x16b   : > { %v1161_v15 = vadd.f32 %v1086_v13, %v992_v12 }
 0x16c   : > { %v1088_v16 = vpop.f32.mrf.mxu0 }
 0x16d   : > { %v1170_v17 = vadd.f32 %v1168_v4, %v1161_v15  ;;  %v1162_v18 = vadd.f32 %v1088_v16, %v993_v14 }
 0x16f   : > { %1173 = vst [vmem:[%s163_s5] sm:$0xff] %v1170_v17  ;;  %v1171_v19 = vadd.f32 %v1168_v4, %v1162_v18 }
 0x171   : > { %1174 = vst [vmem:[%s163_s5 + $0x8] sm:$0xff] %v1171_v19 }
 0x172   : > { %1402 = shalt.err (!%p1399_p3)
}
 0x173   : > { %s1403_s24 = scalar_lea.hbm %s1190_s10, 384  ;;  %s1407_s27 = scalar_lea.hbm %s1653_s3, 768 }
 0x174   : > { %p1404_p4 = scmp.ne.s32.totalorder %s1190_s10, %s1403_s24  ;;  %p1408_p9 = scmp.lt.s32.totalorder %s1190_s10, %s1653_s3 }
 0x175   : > { %p1409_p10 = scmp.lt.s32.totalorder %s1407_s27, %s1403_s24 }
 0x176   : > { %p1405_p7 = pnand %p1404_p4, %p1518_p5 }
 0x177   : > { %p1410_p11 = por %p1409_p10, %p1408_p9 }
 0x178   : > { %p1406_p8 = pneg %p1405_p7 }
 0x17a   : > { %p1411_p12 = pnand %p1410_p11, %p1406_p8 }
 0x17c   : > { %1414 = shalt.err (!%p1411_p12)
}
 0x17d   : > { %1339 = dma.vmem_to_hbm [thread:$0]  (%p1518_p5), %s1193_s7, 384, %s1190_s10, %s1178_s11  }
 0x17e PF: > { %p1345_p13 = scmp.ge.s32.totalorder %s1449_s15, 2  ;;  %s1204_s30 = sand.u32 1, %s1437_s12  }
 0x17f   : > { %s1205_s4 = scalar_lea.sflag [#allocation3], %s1204_s30 }
 0x180   : > { %p1342_p0 = pnand %p1345_p13, %p1522_p6 }
 0x182   : > { %p1343_p1 = pneg %p1342_p0 }
 0x184   : > { %1432 = dma.done.wait (%p1343_p1), %s1205_s4, 384  }
 0x185   : > { %1434 = vsyncadd (%p1343_p1), %s1205_s4, 4294966912  ;;  %p13_p2 = scmp.ge.s32.totalorder %s1505_s18, 4   ;;  %s1656_s12 = smov %s1441_s13 }
 0x186   : > { %s1657_s13 = smov %s1445_s14  ;;  %s1658_s14 = smov %s1516_s21 }
 0x187   : > { %s1659_s15 = smov %s1505_s18  ;;  %15 = sbr.rel (!%p13_p2) target bundleno = 3 (0x3), region = 72 }
 0x18c   :  { %1210 = vsyncpa [#allocation3], 1 }
 0x18d   :  { %1212 = vsyncpa [#allocation3 + $0x1], 1 }

</bundles_post_ra>
